<compile_context>
chip_gen: v5e
topology: v5e:2x2
jax: 0.10.0
libtpu: 0.0.40
codegen_flags: <defaults>
</compile_context>

<pallas_src>
import functools

import jax
import jax.numpy as jnp
from jax.experimental import pallas as pl
from jax.experimental.pallas import tpu as pltpu


def _margin_ce_kernel(logits_ref, targets_ref, ce_ref, margin_ref, *,
                      gamma, aggregation, batch_size, block_rows):
    i = pl.program_id(0)

    logits = logits_ref[...].astype(jnp.float32)          # (TB, C)
    tgt = targets_ref[...]                                 # (TB, 1) int32
    tb, c = logits.shape

    # Mask rows past the true batch (ragged last block / OOB block reads).
    row_ids = i * block_rows + jax.lax.broadcasted_iota(jnp.int32, (tb, 1), 0)
    valid = row_ids < batch_size                           # (TB, 1) bool
    logits = jnp.where(valid, logits, 0.0)                 # keep exp()/max() finite
    tgt = jnp.where(valid, tgt, 0)

    class_ids = jax.lax.broadcasted_iota(jnp.int32, (tb, c), 1)
    is_target = class_ids == tgt                           # (TB, C) bool
    neg_inf = jnp.float32(-jnp.inf)

    # ---- cross entropy: (max + log-sum-exp) - target_logit ----
    max_l = jnp.max(logits, axis=1, keepdims=True)
    sumexp = jnp.sum(jnp.exp(logits - max_l), axis=1, keepdims=True)
    lse = max_l + jnp.log(sumexp)                          # (TB, 1)
    correct = jnp.max(jnp.where(is_target, logits, neg_inf),
                      axis=1, keepdims=True)               # (TB, 1) target logit
    ce_per = lse - correct                                 # (TB, 1)

    # ---- SimpleLargeMarginLoss margin term (no (TB, C) viol materialized for max) ----
    if aggregation == 'max':
        worst_other = jnp.max(jnp.where(is_target, neg_inf, logits),
                              axis=1, keepdims=True)       # (TB, 1)
        per_sample = jnp.maximum(gamma + worst_other - correct, 0.0)
    else:
        viol = jnp.where(is_target, 0.0,
                         jnp.maximum(gamma + logits - correct, 0.0))
        per_sample = jnp.sum(viol, axis=1, keepdims=True)

    ce_per = jnp.where(valid, ce_per, 0.0)
    per_sample = jnp.where(valid, per_sample, 0.0)

    # Per-block partial sums; wrapper divides by the global batch size.
    ce_ref[...] = jnp.sum(ce_per, axis=0, keepdims=True)        # (1, 1)
    margin_ref[...] = jnp.sum(per_sample, axis=0, keepdims=True)


def _round_up(x, m):
    return ((x + m - 1) // m) * m


def _choose_block_rows(batch, num_classes, itemsize):
    # Keep one logits block <= ~4 MiB so double-buffering (x2) stays well
    # inside v7x's 64 MiB physical / 32 MiB default-scoped VMEM, while still
    # being large enough to amortize the ~0.35 us per-step overhead.
    target_bytes = 4 * 1024 * 1024
    mult = 16 if itemsize < 4 else 8                 # bf16 min sublane tile is 16
    tb = (target_bytes // max(1, num_classes * itemsize)) // mult * mult
    tb = max(mult, tb)
    tb = min(tb, _round_up(batch, mult))
    return tb


def margin_ce_pallas(logits, targets, gamma, aggregation='max'):
    """Returns (ce_loss, margin_loss) scalars computed in one gridded Pallas kernel."""
    b, c = logits.shape
    targets_2d = targets.reshape(b, 1).astype(jnp.int32)
    itemsize = jnp.dtype(logits.dtype).itemsize
    tb = _choose_block_rows(b, c, itemsize)
    num_blocks = pl.cdiv(b, tb)

    # TODO(synk): for very large vocabularies (C >= 16k-32k) add a second
    # "arbitrary" grid axis over classes with an online logsumexp/max carry.

    kernel = functools.partial(
        _margin_ce_kernel, gamma=float(gamma), aggregation=aggregation,
        batch_size=b, block_rows=tb)

    cost = pl.CostEstimate(
        flops=10 * b * c,
        transcendentals=b * c,
        bytes_accessed=b * c * itemsize + b * 4 + 8 * num_blocks)

    ce_parts, margin_parts = pl.pallas_call(
        kernel,
        grid=(num_blocks,),
        out_shape=(jax.ShapeDtypeStruct((1, num_blocks), jnp.float32),
                   jax.ShapeDtypeStruct((1, num_blocks), jnp.float32)),
        in_specs=[pl.BlockSpec((tb, c), lambda i: (i, 0)),
                  pl.BlockSpec((tb, 1), lambda i: (i, 0))],
        out_specs=(pl.BlockSpec((1, 1), lambda i: (0, i)),
                   pl.BlockSpec((1, 1), lambda i: (0, i))),
        compiler_params=pltpu.CompilerParams(
            dimension_semantics=("parallel",)),
        cost_estimate=cost,
    )(logits, targets_2d)

    inv_b = 1.0 / b
    ce = jnp.sum(ce_parts) * inv_b
    margin = jnp.sum(margin_parts) * inv_b
    return ce, margin


class SimpleLargeMarginLoss:
    """JAX/Pallas port of SimpleLargeMarginLoss (forward only)."""

    def __init__(self, gamma=10.0, aggregation='max'):
        self.gamma = gamma
        self.aggregation = aggregation

    def __call__(self, logits, targets):
        ce, margin = margin_ce_pallas(logits, targets, self.gamma, self.aggregation)
        return 0.8 * ce + 0.2 * margin


class MultiLayerMarginLoss:
    """JAX/Pallas port of MultiLayerMarginLoss (forward only)."""

    def __init__(self, layers, gamma=0.5, norm='l2', aggregation='max', epsilon=1e-6):
        self.layers = layers
        if isinstance(gamma, (int, float)):
            self.gamma = [gamma * 0.5 if i > 0 else gamma for i in range(len(layers))]
        else:
            self.gamma = gamma
        if isinstance(norm, str):
            self.norm = [norm] * len(layers)
        else:
            self.norm = norm
        self.aggregation = aggregation
        self.epsilon = epsilon
        self._simple_gamma = gamma if isinstance(gamma, (int, float)) else gamma[0]
        self.simple_margin = SimpleLargeMarginLoss(gamma=self._simple_gamma,
                                                   aggregation=aggregation)
        self.epoch = 0
        self.training = True

    def update_epoch(self, epoch):
        self.epoch = epoch

    def __call__(self, logits, targets, activations=None):
        # One kernel call produces both the CE term and the simple-margin term.
        ce_loss, simple_margin = margin_ce_pallas(
            logits, targets, self._simple_gamma, self.aggregation)

        if activations is None or not self.training:
            return ce_loss

        needed = max(abs(layer_idx) for layer_idx in self.layers) + 1
        if len(activations) < needed:
            raise ValueError(
                f'Not enough activations provided. Need at least {needed}, '
                f'got {len(activations)}')

        simple_loss = 0.8 * ce_loss + 0.2 * simple_margin
        # TODO(synk): the per-sample torch.autograd.grad dual-norm layer-margin
        # computation has no forward-only Pallas equivalent; we take the
        # module's own len(margin_losses)==0 fallback branch.
        return 0.8 * ce_loss + 0.2 * simple_loss


if __name__ == "__main__":
    B, C = 8, 32
    key = jax.random.PRNGKey(0)
    k_logits, k_tgt = jax.random.split(key)
    logits = jax.random.normal(k_logits, (B, C), dtype=jnp.float32)
    targets = jax.random.randint(k_tgt, (B,), 0, C, dtype=jnp.int32)

    loss_mod = MultiLayerMarginLoss(layers=[0, -1], gamma=0.5, aggregation='max')

    # Path 1: no activations -> pure cross-entropy.
    ce_only = loss_mod(logits, targets, activations=None)
    # Path 2: activations provided (fallback branch -> 0.8*ce + 0.2*simple).
    dummy_acts = [jnp.zeros((B, 16), jnp.float32), jnp.zeros((B, 16), jnp.float32)]
    total = loss_mod(logits, targets, activations=dummy_acts)
    jax.block_until_ready(ce_only)
    jax.block_until_ready(total)

    # Pure-JAX reference (f32 path, aggregation='max').
    log_probs = jax.nn.log_softmax(logits, axis=1)
    ce_ref = -jnp.mean(log_probs[jnp.arange(B), targets])
    one_hot = jax.nn.one_hot(targets, C, dtype=jnp.float32)
    correct = jnp.sum(logits * one_hot, axis=1, keepdims=True)
    viol = jnp.maximum((0.5 + logits - correct) * (1.0 - one_hot), 0.0)
    margin_ref = jnp.mean(jnp.max(viol, axis=1))
    simple_ref = 0.8 * ce_ref + 0.2 * margin_ref
    total_ref = 0.8 * ce_ref + 0.2 * simple_ref

    assert jnp.allclose(ce_only, ce_ref, rtol=1e-5, atol=1e-5), (ce_only, ce_ref)
    assert jnp.allclose(total, total_ref, rtol=1e-5, atol=1e-5), (total, total_ref)

    # aggregation='sum' path.
    ce_s, margin_s = margin_ce_pallas(logits, targets, 0.5, 'sum')
    jax.block_until_ready(margin_s)
    margin_sum_ref = jnp.mean(jnp.sum(viol, axis=1))
    assert jnp.allclose(ce_s, ce_ref, rtol=1e-5, atol=1e-5), (ce_s, ce_ref)
    assert jnp.allclose(margin_s, margin_sum_ref, rtol=1e-5, atol=1e-5), (
        margin_s, margin_sum_ref)

    # bf16 logits go straight into the kernel (no wrapper-side f32 copy).
    logits_bf16 = logits.astype(jnp.bfloat16)
    ce_b, margin_b = margin_ce_pallas(logits_bf16, targets, 0.5, 'max')
    jax.block_until_ready(margin_b)
    lb = logits_bf16.astype(jnp.float32)
    lp_b = jax.nn.log_softmax(lb, axis=1)
    ce_b_ref = -jnp.mean(lp_b[jnp.arange(B), targets])
    corr_b = jnp.sum(lb * one_hot, axis=1, keepdims=True)
    viol_b = jnp.maximum((0.5 + lb - corr_b) * (1.0 - one_hot), 0.0)
    margin_b_ref = jnp.mean(jnp.max(viol_b, axis=1))
    assert jnp.allclose(ce_b, ce_b_ref, rtol=1e-3, atol=1e-3), (ce_b, ce_b_ref)
    assert jnp.allclose(margin_b, margin_b_ref, rtol=1e-3, atol=1e-3), (
        margin_b, margin_b_ref)

    print("KERNEL_OK")
</pallas_src>

<mosaic_0001>
module attributes {stable_mosaic.version = 11 : i64} {
  func.func @_margin_ce_kernel(%arg0: i32, %arg1: memref<8x32xf32, #tpu.memory_space<vmem>>, %arg2: memref<8x1xi32, #tpu.memory_space<vmem>>, %arg3: memref<1x1xf32, #tpu.memory_space<vmem>>, %arg4: memref<1x1xf32, #tpu.memory_space<vmem>>) attributes {dimension_semantics = [#tpu.dimension_semantics<parallel>], iteration_bounds = array<i64: 1>, scalar_prefetch = 0 : i64, scratch_operands = 0 : i64, tpu.core_type = #tpu.core_type<tc>, window_params = [{transform_indices = @transform_0, window_bounds = array<i64: 8, 32>}, {transform_indices = @transform_1, window_bounds = array<i64: 8, 1>}, {transform_indices = @transform_2, window_bounds = array<i64: 1, 1>}, {transform_indices = @transform_3, window_bounds = array<i64: 1, 1>}]} {
    %c0 = arith.constant 0 : index
    %c0_0 = arith.constant 0 : index
    %0 = vector.load %arg1[%c0, %c0_0] : memref<8x32xf32, #tpu.memory_space<vmem>>, vector<8x32xf32>
    %c0_1 = arith.constant 0 : index
    %c0_2 = arith.constant 0 : index
    %1 = vector.load %arg2[%c0_1, %c0_2] : memref<8x1xi32, #tpu.memory_space<vmem>>, vector<8x1xi32>
    %c8_i32 = arith.constant 8 : i32
    %2 = arith.muli %arg0, %c8_i32 : i32
    %3 = tpu.iota {dimensions = array<i32: 0>} : vector<8x1xi32>
    %4 = vector.broadcast %2 : i32 to vector<8x1xi32>
    %5 = arith.addi %4, %3 : vector<8x1xi32>
    %c8_i32_3 = arith.constant 8 : i32
    %6 = vector.broadcast %c8_i32_3 : i32 to vector<8x1xi32>
    %7 = arith.cmpi slt, %5, %6 : vector<8x1xi32>
    %cst = arith.constant 0.000000e+00 : f32
    %8 = vector.shape_cast %7 : vector<8x1xi1> to vector<8x1xi1>
    %9 = vector.broadcast %8 : vector<8x1xi1> to vector<8x32xi1>
    %10 = vector.broadcast %cst : f32 to vector<8x32xf32>
    %11 = arith.select %9, %0, %10 : vector<8x32xi1>, vector<8x32xf32>
    %c0_i32 = arith.constant 0 : i32
    %12 = vector.broadcast %c0_i32 : i32 to vector<8x1xi32>
    %13 = arith.select %7, %1, %12 : vector<8x1xi1>, vector<8x1xi32>
    %14 = tpu.iota {dimensions = array<i32: 1>} : vector<8x32xi32>
    %15 = vector.broadcast %13 : vector<8x1xi32> to vector<8x32xi32>
    %16 = arith.cmpi eq, %14, %15 : vector<8x32xi32>
    %cst_4 = arith.constant dense<0xFF800000> : vector<8xf32>
    %17 = vector.multi_reduction <maximumf>, %11, %cst_4 [1] : vector<8x32xf32> to vector<8xf32>
    %18 = vector.shape_cast %17 : vector<8xf32> to vector<8x1xf32>
    %19 = vector.broadcast %18 : vector<8x1xf32> to vector<8x32xf32>
    %20 = arith.subf %11, %19 : vector<8x32xf32>
    %21 = math.exp %20 : vector<8x32xf32>
    %cst_5 = arith.constant dense<0.000000e+00> : vector<8xf32>
    %22 = vector.multi_reduction <add>, %21, %cst_5 [1] : vector<8x32xf32> to vector<8xf32>
    %23 = vector.shape_cast %22 : vector<8xf32> to vector<8x1xf32>
    %24 = math.log %23 : vector<8x1xf32>
    %25 = arith.addf %18, %24 : vector<8x1xf32>
    %cst_6 = arith.constant 0xFF800000 : f32
    %26 = vector.broadcast %cst_6 : f32 to vector<8x32xf32>
    %27 = arith.select %16, %11, %26 : vector<8x32xi1>, vector<8x32xf32>
    %cst_7 = arith.constant dense<0xFF800000> : vector<8xf32>
    %28 = vector.multi_reduction <maximumf>, %27, %cst_7 [1] : vector<8x32xf32> to vector<8xf32>
    %29 = vector.shape_cast %28 : vector<8xf32> to vector<8x1xf32>
    %30 = arith.subf %25, %29 : vector<8x1xf32>
    %cst_8 = arith.constant 0xFF800000 : f32
    %31 = vector.broadcast %cst_8 : f32 to vector<8x32xf32>
    %32 = arith.select %16, %31, %11 : vector<8x32xi1>, vector<8x32xf32>
    %cst_9 = arith.constant dense<0xFF800000> : vector<8xf32>
    %33 = vector.multi_reduction <maximumf>, %32, %cst_9 [1] : vector<8x32xf32> to vector<8xf32>
    %34 = vector.shape_cast %33 : vector<8xf32> to vector<8x1xf32>
    %cst_10 = arith.constant 5.000000e-01 : f32
    %35 = vector.broadcast %cst_10 : f32 to vector<8x1xf32>
    %36 = arith.addf %35, %34 : vector<8x1xf32>
    %37 = arith.subf %36, %29 : vector<8x1xf32>
    %cst_11 = arith.constant 0.000000e+00 : f32
    %38 = vector.broadcast %cst_11 : f32 to vector<8x1xf32>
    %39 = arith.maximumf %37, %38 : vector<8x1xf32>
    %cst_12 = arith.constant 0.000000e+00 : f32
    %40 = vector.broadcast %cst_12 : f32 to vector<8x1xf32>
    %41 = arith.select %7, %30, %40 : vector<8x1xi1>, vector<8x1xf32>
    %cst_13 = arith.constant 0.000000e+00 : f32
    %42 = vector.broadcast %cst_13 : f32 to vector<8x1xf32>
    %43 = arith.select %7, %39, %42 : vector<8x1xi1>, vector<8x1xf32>
    %cst_14 = arith.constant dense<0.000000e+00> : vector<1xf32>
    %44 = vector.multi_reduction <add>, %41, %cst_14 [0] : vector<8x1xf32> to vector<1xf32>
    %45 = vector.shape_cast %44 : vector<1xf32> to vector<1x1xf32>
    %c0_15 = arith.constant 0 : index
    %c0_16 = arith.constant 0 : index
    %46 = vector.load %arg3[%c0_15, %c0_16] : memref<1x1xf32, #tpu.memory_space<vmem>>, vector<1x1xf32>
    tpu.vector_store %arg3[%c0_15, %c0_16], %45 {strides = array<i32>} : memref<1x1xf32, #tpu.memory_space<vmem>>, vector<1x1xf32>,
    %cst_17 = arith.constant dense<0.000000e+00> : vector<1xf32>
    %47 = vector.multi_reduction <add>, %43, %cst_17 [0] : vector<8x1xf32> to vector<1xf32>
    %48 = vector.shape_cast %47 : vector<1xf32> to vector<1x1xf32>
    %c0_18 = arith.constant 0 : index
    %c0_19 = arith.constant 0 : index
    %49 = vector.load %arg4[%c0_18, %c0_19] : memref<1x1xf32, #tpu.memory_space<vmem>>, vector<1x1xf32>
    tpu.vector_store %arg4[%c0_18, %c0_19], %48 {strides = array<i32>} : memref<1x1xf32, #tpu.memory_space<vmem>>, vector<1x1xf32>,
    return
  }
  func.func @transform_0(%arg0: i32) -> (i32, i32) {
    %c0_i32 = arith.constant 0 : i32
    %c0_i32_0 = arith.constant 0 : i32
    return %arg0, %c0_i32 : i32, i32
  }
  func.func @transform_1(%arg0: i32) -> (i32, i32) {
    %c0_i32 = arith.constant 0 : i32
    %c0_i32_0 = arith.constant 0 : i32
    return %arg0, %c0_i32 : i32, i32
  }
  func.func @transform_2(%arg0: i32) -> (i32, i32) {
    %c0_i32 = arith.constant 0 : i32
    %c0_i32_0 = arith.constant 0 : i32
    return %c0_i32, %arg0 : i32, i32
  }
  func.func @transform_3(%arg0: i32) -> (i32, i32) {
    %c0_i32 = arith.constant 0 : i32
    %c0_i32_0 = arith.constant 0 : i32
    return %c0_i32, %arg0 : i32, i32
  }
}

</mosaic_0001>

<bundles_post_ra>
// kernel: tpu_custom_call.1
= control target key start
LH: loop header
LB: loop body
LE: loop exit
PB: predicated region body
PF: predicated region fallthrough
CT: control target
= control target key end

     0   :  { %9 = vsyncpa [#allocation3], 0  ;;  %vm33_vm0 = vcmask 261120   ;;  %s206_s0 = inlined_call_operand.vmem [shape: f32[8,32], index: 0, kind: input, shape index: {}]   ;;  %s207_s1 = inlined_call_operand.vmem [shape: s32[8,1], index: 1, kind: input, shape index: {}]   ;;  %s208_s2 = inlined_call_operand.hbm [shape: f32[1,1], index: 2, kind: output, shape index: {0}]   ;;  %s209_s3 = inlined_call_operand.hbm [shape: f32[1,1], index: 3, kind: output, shape index: {1}]  }
   0x1   :  { %v15_v0 = vld [vmem:[%s206_s0] sm:$0xff] }
   0x2   :  { %10 = vsyncpa [#allocation5], 0  ;;  %v34_v1 = vsel %vm33_vm0, %v15_v0, -inf  ;;  %v167_v2 = vmov 0   ;;  %v16_v3 = vld [vmem:[%s207_s1] sm:$0xff]  ;;  %v27_v9 = vlaneseq  ;;  %s168_s0 = smov [#allocation2]  }
   0x3   :  { %110 = vset.pattern.permute.xlu0 %v167_v2  ;;  %s80_s1 = sshll.u32 %s168_s0, 4  ;;  %s82_s18 = sshll.u32 %s208_s2, 4  ;;  %vm66_vm2 = vcmask 0   ;;  %s81_s1 = int_to_ptr.vmem [resolvable:$true] %s80_s1  ;;  %s83_s18 = int_to_ptr.hbm [resolvable:$true] %s82_s18 }
   0x4   :  { %35 = vmax.xlane.f32.xlu0 %v34_v1  ;;  %v28_v10 = vand.u32 127, %v27_v9  ;;  %s169_s19 = smov [#allocation4]   ;;  %s93_s23 = sshll.u32 %s209_s3, 4  ;;  %s94_s23 = int_to_ptr.hbm [resolvable:$true] %s93_s23 }
   0x5   :  { %s91_s20 = sshll.u32 %s169_s19, 4  ;;  %s92_s20 = int_to_ptr.vmem [resolvable:$true] %s91_s20 }
  0x18   :  { %30 = vperm.xlu0 %110, %v16_v3  }
  0x77   :  { %v36_v4 = vpop.xlane.xlu0 %35 }
  0x78   :  { %v37_v5 = vsub.f32 %v15_v0, %v36_v4 }
  0x7a   :  { %v38_v6 = vmul.f32 1.442695, %v37_v5 }
  0x7c   :  { %111 = vpow2.f32 %v38_v6 }
  0x82   :  { %v112_v7 = vpop.eup %111 }
  0x83   :  { %v40_v8 = vsel %vm33_vm0, %v112_v7, 0.0 }
  0x84   :  { %41 = vadd.xlane.f32.xlu1 %v40_v8 }
  0x8a   :  { %v31_v11 = vpop.permute.xlu0 %30 }
  0x8b   :  { %vm32_vm1 = vcmp.eq.s32.totalorder %v28_v10, %v31_v11 }
  0x8c   :  { %v51_v12 = vsel %vm32_vm1, -inf, %v15_v0  ;;  %v46_v13 = vsel %vm32_vm1, %v15_v0, -inf }
  0x8d   :  { %v52_v14 = vsel %vm33_vm0, %v51_v12, -inf  ;;  %v47_v15 = vsel %vm33_vm0, %v46_v13, -inf }
  0x8e   :  { %53 = vmax.xlane.f32.xlu1 %v52_v14  ;;  %48 = vmax.xlane.f32.xlu2 %v47_v15 }
  0xf7   :  { %v42_v16 = vpop.xlane.xlu1 %41 }
  0xf8   :  { %113 = vlog2.f32 %v42_v16 }
  0xfe   :  { %v114_v17 = vpop.eup %113 }
  0xff   :  { %v44_v18 = vmul.f32 0.6931472, %v114_v17 }
 0x101   :  { %v54_v19 = vpop.xlane.xlu1 %53  ;;  %v45_v20 = vadd.f32 %v44_v18, %v36_v4  ;;  %v49_v21 = vpop.xlane.xlu2 %48 }
 0x102   :  { %v55_v22 = vadd.f32 0.5, %v54_v19 }
 0x103   :  { %v50_v23 = vsub.f32 %v45_v20, %v49_v21 }
 0x104   :  { %v56_v24 = vsub.f32 %v55_v22, %v49_v21 }
 0x105   :  { %v60_v25 = vrot.slane %v50_v23, 4 }
 0x106   :  { %v57_v26 = vmax.f32 %v56_v24, 0.0 }
 0x107   :  { %v61_v27 = vadd.f32 %v60_v25, %v50_v23 }
 0x108   :  { %v68_v28 = vrot.slane %v57_v26, 4 }
 0x109   :  { %v62_v29 = vrot.slane %v61_v27, 2 }
 0x10a   :  { %v69_v30 = vadd.f32 %v68_v28, %v57_v26 }
 0x10b   :  { %v63_v31 = vadd.f32 %v62_v29, %v61_v27 }
 0x10c   :  { %v70_v32 = vrot.slane %v69_v30, 2 }
 0x10d   :  { %v64_v33 = vrot.slane %v63_v31, 1 }
 0x10e   :  { %v71_v34 = vadd.f32 %v70_v32, %v69_v30 }
 0x10f   :  { %v65_v35 = vadd.f32 %v64_v33, %v63_v31 }
 0x110   :  { %v72_v36 = vrot.slane %v71_v34, 1 }
 0x111   :  { %67 = vst.msk [vmem:[#allocation2] sm:$0x1] %vm66_vm2, %v65_v35 }
 0x112   :  { %85 = dma.vmem_to_hbm [thread:$0]  %s81_s1, 16, %s83_s18, [#allocation3]   ;;  %v73_v37 = vadd.f32 %v72_v36, %v71_v34 }
 0x114   :  { %74 = vst.msk [vmem:[#allocation4] sm:$0x1] %vm66_vm2, %v73_v37 }
 0x115   :  { %96 = dma.vmem_to_hbm [thread:$0]  %s92_s20, 16, %s94_s23, [#allocation5]  }
 0x116   :  { %163 = dma.done.wait [#allocation3], 16  }
 0x117   :  { %164 = vsyncadd [#allocation3], 4294967280 }
 0x118   :  { %165 = dma.done.wait [#allocation5], 16  }
 0x119   :  { %166 = vsyncadd [#allocation5], 4294967280 }
 0x11a   :  { %105 = vsyncpa [#allocation3], 1 }
 0x11b   :  { %106 = vsyncpa [#allocation5], 1 }

</bundles_post_ra>
